<compile_context>
chip_gen: v6e
topology: v6e:2x2x1
jax: 0.10.0
libtpu: 0.0.40
codegen_flags: <defaults>
</compile_context>

<pallas_src>
import jax
import jax.numpy as jnp
from jax.experimental import pallas as pl
from jax.experimental.pallas import tpu as pltpu


def _round_up(x, m):
    return ((x + m - 1) // m) * m


# ---------------------------------------------------------------------------
# Hardware detection / tile selection
# ---------------------------------------------------------------------------

def _tpu_config():
    """Return (device_kind_lowercase, vmem_capacity_bytes)."""
    kind = ""
    try:
        kind = jax.devices()[0].device_kind.lower()
    except Exception:
        pass
    vmem_cap = None
    try:
        vmem_cap = int(pltpu.get_tpu_info().vmem_capacity_bytes)
    except Exception:
        vmem_cap = None
    if not vmem_cap or vmem_cap <= 0:
        # v7x has 64 MiB per TensorCore; v5e/v6e have 128 MiB.
        vmem_cap = (64 << 20) if "v7" in kind else (128 << 20)
    return kind, vmem_cap


def _tile_vmem_need(tm, th, D, itemsize, weight_buffers):
    """Estimated VMEM for double-buffered x/w13/w2/out tiles + f32 accumulator."""
    need = 2 * (tm * D + D * 2 * th + th * D + tm * D) * itemsize + tm * D * 4
    if weight_buffers is not None and weight_buffers > 2:
        need += (weight_buffers - 2) * (D * 2 * th + th * D) * itemsize
    return need


def _select_tiles(D, H, itemsize, kind, vmem_budget, tm, th, sub_align):
    """Generation-aware default tile sizes, shrunk until they fit the budget."""
    if "v7" in kind:
        tm_d, th_d = 384, 256
    elif "v6" in kind:
        tm_d, th_d = 512, 512
    elif "v5" in kind:
        tm_d, th_d = 256, 512
    else:
        tm_d, th_d = 256, 256          # conservative for unknown hardware
    tm = tm_d if tm is None else tm
    th = th_d if th is None else th

    lane_align = 128 if "v5" in kind else 256
    th_eff = min(th, _round_up(H, lane_align))
    th_eff = _round_up(th_eff, 128)
    tm_eff = _round_up(max(tm, sub_align), sub_align)

    # Shrink hidden tile first, then token tile, until the working set fits.
    while _tile_vmem_need(tm_eff, th_eff, D, itemsize, None) > vmem_budget and th_eff > 128:
        th_eff = max(128, _round_up(th_eff // 2, 128))
    while _tile_vmem_need(tm_eff, th_eff, D, itemsize, None) > vmem_budget and tm_eff > sub_align:
        tm_eff = max(sub_align, _round_up(tm_eff // 2, sub_align))
    return tm_eff, th_eff


def _weight_spec(shape, index_map, buffers):
    """BlockSpec with optional deeper pipelining; falls back to default."""
    if buffers is not None and buffers != 2:
        try:
            return pl.BlockSpec(shape, index_map, pipeline_mode=pl.Buffered(buffers))
        except TypeError:
            pass
    return pl.BlockSpec(shape, index_map)


# ---------------------------------------------------------------------------
# Kernel
# ---------------------------------------------------------------------------

def _swiglu_kernel(x_ref, w13_ref, w2_ref, o_ref, acc_ref):
    # x_ref  : (tm, D)        token tile
    # w13_ref: (D, 2*th)      [W1 tile | W3 tile] for hidden block k
    # w2_ref : (th, D)        W2 tile for hidden block k
    # o_ref  : (tm, D)        output tile (resident across the k axis)
    # acc_ref: (tm, D) f32    VMEM accumulator scratch
    k = pl.program_id(1)

    @pl.when(k == 0)
    def _init():
        acc_ref[...] = jnp.zeros_like(acc_ref)

    th = w2_ref.shape[0]
    x = x_ref[...]
    # Two MXU passes on ref slices of the fused [W1|W3] tile.  Ref slicing is
    # free; this avoids materializing a (tm, 2*th) f32 intermediate + copies.
    h1 = jnp.dot(x, w13_ref[:, :th], preferred_element_type=jnp.float32)
    h3 = jnp.dot(x, w13_ref[:, th:], preferred_element_type=jnp.float32)
    # SiLU(h1) * h3 in f32 (sigmoid on EUP, mul on VPU -> hidden under MXU).
    g = h1 * jax.nn.sigmoid(h1) * h3
    # Down projection, accumulated over hidden tiles in f32.
    acc_ref[...] += jnp.dot(g.astype(w2_ref.dtype), w2_ref[...],
                            preferred_element_type=jnp.float32)

    @pl.when(k == pl.num_programs(1) - 1)
    def _finalize():
        o_ref[...] = acc_ref[...].astype(o_ref.dtype)


# ---------------------------------------------------------------------------
# Weight packing (do ONCE at init; cache the result across forward calls)
# ---------------------------------------------------------------------------

def swiglu_pack_weights(w1, w3, w2, *, tm=None, th=None,
                        compute_dtype=jnp.bfloat16):
    """Cast / pad / interleave the weights once.

    Weights are stored [in_features, out_features] (transpose of nn.Linear).
    Returns (w13, w2p, cfg); pass these to swiglu_pallas_packed.
    """
    D, H = w1.shape
    assert w3.shape == (D, H) and w2.shape == (H, D)

    kind, vmem_cap = _tpu_config()
    vmem_budget = int(0.9 * vmem_cap)
    cd = jnp.dtype(compute_dtype)
    sub_align = 16 if cd.itemsize < 4 else 8

    tm_sel, th_eff = _select_tiles(D, H, cd.itemsize, kind, vmem_budget,
                                   tm, th, sub_align)

    H_pad = _round_up(H, th_eff)
    nk = H_pad // th_eff

    w1p = jnp.pad(w1.astype(cd), ((0, 0), (0, H_pad - H)))
    w3p = jnp.pad(w3.astype(cd), ((0, 0), (0, H_pad - H)))
    w2p = jnp.pad(w2.astype(cd), ((0, H_pad - H), (0, 0)))
    # Interleave per hidden tile so block k is [W1 tile k | W3 tile k].
    w13 = jnp.concatenate(
        [w1p.reshape(D, nk, th_eff), w3p.reshape(D, nk, th_eff)], axis=2
    ).reshape(D, 2 * H_pad)

    cfg = dict(tm=tm_sel, th=th_eff, D=D, H=H, H_pad=H_pad,
               compute_dtype=cd, kind=kind, vmem_cap=vmem_cap)
    return w13, w2p, cfg


# ---------------------------------------------------------------------------
# Forward call with pre-packed weights
# ---------------------------------------------------------------------------

def swiglu_pallas_packed(x, w13, w2p, cfg):
    """x: [..., dim] -> [..., dim] using packed weights from swiglu_pack_weights."""
    orig_shape = x.shape
    out_dtype = x.dtype
    D = cfg["D"]
    th = cfg["th"]
    H_pad = cfg["H_pad"]
    cd = cfg["compute_dtype"]
    kind = cfg["kind"]
    sub_align = 16 if cd.itemsize < 4 else 8
    itemsize = cd.itemsize

    x2d = x.reshape(-1, D).astype(cd)            # [M, D]
    M = x2d.shape[0]
    nk = H_pad // th

    # v5e: spend spare VMEM on deeper weight buffering (hides DMA jitter).
    weight_buffers = 3 if ("v5" in kind and nk >= 4) else None

    # Token tile: capped by problem size and (if needed) by the VMEM budget.
    vmem_budget = int(0.9 * cfg["vmem_cap"])
    tm_eff = min(cfg["tm"], _round_up(M, sub_align))
    tm_eff = _round_up(tm_eff, sub_align)
    while (_tile_vmem_need(tm_eff, th, D, itemsize, weight_buffers) > vmem_budget
           and tm_eff > sub_align):
        tm_eff = max(sub_align, _round_up(tm_eff // 2, sub_align))

    M_pad = _round_up(M, tm_eff)
    if M_pad != M:
        x2d = jnp.pad(x2d, ((0, M_pad - M), (0, 0)))
    n_token_tiles = M_pad // tm_eff

    vmem_need = _tile_vmem_need(tm_eff, th, D, itemsize, weight_buffers)
    vmem_limit = int(min(max(vmem_need + (2 << 20), 32 << 20), vmem_budget))

    cost = pl.CostEstimate(
        flops=6 * M_pad * D * H_pad,                     # 2*M*D*2H + 2*M*H*D
        transcendentals=M_pad * H_pad,                   # sigmoid
        bytes_accessed=(x2d.size * itemsize
                        + (w13.size + w2p.size) * itemsize * n_token_tiles
                        + M_pad * D * jnp.dtype(out_dtype).itemsize),
    )

    out = pl.pallas_call(
        _swiglu_kernel,
        out_shape=jax.ShapeDtypeStruct((M_pad, D), out_dtype),
        grid_spec=pltpu.PrefetchScalarGridSpec(
            num_scalar_prefetch=0,
            grid=(n_token_tiles, nk),                    # reduction axis last
            in_specs=[
                pl.BlockSpec((tm_eff, D), lambda i, k: (i, 0)),              # x
                _weight_spec((D, 2 * th), lambda i, k: (0, k), weight_buffers),  # [w1|w3]
                _weight_spec((th, D), lambda i, k: (k, 0), weight_buffers),      # w2
            ],
            out_specs=pl.BlockSpec((tm_eff, D), lambda i, k: (i, 0)),
            scratch_shapes=[pltpu.VMEM((tm_eff, D), jnp.float32)],
        ),
        compiler_params=pltpu.CompilerParams(
            dimension_semantics=("parallel", "arbitrary"),
            vmem_limit_bytes=vmem_limit,
        ),
        cost_estimate=cost,
    )(x2d, w13, w2p)

    return out[:M].reshape(orig_shape)


def swiglu_pallas(x, w1, w3, w2, *, tm=None, th=None,
                  compute_dtype=jnp.bfloat16):
    """One-shot convenience wrapper.

    For production use, call swiglu_pack_weights() once at weight-load time and
    reuse (w13, w2p, cfg) across forward calls (the packing costs HBM traffic
    comparable to the kernel's own weight stream).
    """
    w13, w2p, cfg = swiglu_pack_weights(w1, w3, w2, tm=tm, th=th,
                                        compute_dtype=compute_dtype)
    return swiglu_pallas_packed(x, w13, w2p, cfg)


# ---------------------------------------------------------------------------
# Reference + demo
# ---------------------------------------------------------------------------

def swiglu_ref(x, w1, w3, w2):
    h1 = x @ w1
    h3 = x @ w3
    return (jax.nn.silu(h1) * h3) @ w2


def default_hidden_dim(dim, multiple_of=4):
    hidden_dim = 4 * dim
    hidden_dim = int(2 * hidden_dim / 3)
    hidden_dim = multiple_of * ((hidden_dim + multiple_of - 1) // multiple_of)
    return hidden_dim


if __name__ == "__main__":
    # Small shapes consistent with the module: x is [batch, seq, dim].
    batch, seq, dim = 2, 8, 32
    hidden = default_hidden_dim(dim)              # = 88 for dim=32

    key = jax.random.PRNGKey(0)
    kx, k1, k2, k3 = jax.random.split(key, 4)

    x = jax.random.normal(kx, (batch, seq, dim), dtype=jnp.float32)
    # Deterministic synthetic weights (Linear without bias), stored [in, out].
    w1 = jax.random.normal(k1, (dim, hidden), dtype=jnp.float32) * (1.0 / dim ** 0.5)
    w3 = jax.random.normal(k3, (dim, hidden), dtype=jnp.float32) * (1.0 / dim ** 0.5)
    w2 = jax.random.normal(k2, (hidden, dim), dtype=jnp.float32) * (1.0 / hidden ** 0.5)

    y_ref = swiglu_ref(x, w1, w3, w2)

    # Exact-precision path (compute in f32) -> tight tolerance check.
    w13_f32, w2p_f32, cfg_f32 = swiglu_pack_weights(
        w1, w3, w2, compute_dtype=jnp.float32)
    y_f32 = swiglu_pallas_packed(x, w13_f32, w2p_f32, cfg_f32)
    jax.block_until_ready(y_f32)
    assert y_f32.shape == x.shape
    assert jnp.allclose(y_f32, y_ref, atol=1e-4, rtol=1e-4), "f32 mismatch vs reference"

    # Default performance path (bf16 MXU inputs, f32 accumulation), with the
    # packed weights cached and reused across calls.
    w13_bf, w2p_bf, cfg_bf = swiglu_pack_weights(w1, w3, w2)
    y = swiglu_pallas_packed(x, w13_bf, w2p_bf, cfg_bf)
    jax.block_until_ready(y)
    assert y.shape == x.shape
    assert jnp.allclose(y.astype(jnp.float32), y_ref, atol=5e-2, rtol=5e-2), \
        "bf16 mismatch vs reference"

    print("KERNEL_OK")
</pallas_src>

<mosaic_0001>
module attributes {stable_mosaic.version = 11 : i64} {
  func.func @_swiglu_kernel(%arg0: i32, %arg1: i32, %arg2: memref<16x32xf32, #tpu.memory_space<vmem>>, %arg3: memref<32x512xf32, #tpu.memory_space<vmem>>, %arg4: memref<256x32xf32, #tpu.memory_space<vmem>>, %arg5: memref<16x32xf32, #tpu.memory_space<vmem>>, %arg6: memref<16x32xf32, #tpu.memory_space<vmem>>) attributes {dimension_semantics = [#tpu.dimension_semantics<parallel>, #tpu.dimension_semantics<arbitrary>], iteration_bounds = array<i64: 1, 1>, scalar_prefetch = 0 : i64, scratch_operands = 1 : i64, tpu.core_type = #tpu.core_type<tc>, window_params = [{transform_indices = @transform_0, window_bounds = array<i64: 16, 32>}, {transform_indices = @transform_1, window_bounds = array<i64: 32, 512>}, {transform_indices = @transform_2, window_bounds = array<i64: 256, 32>}, {transform_indices = @transform_3, window_bounds = array<i64: 16, 32>}]} {
    %c0_i32 = arith.constant 0 : i32
    %0 = arith.cmpi eq, %arg1, %c0_i32 : i32
    %1 = arith.extui %0 : i1 to i32
    %c0_i32_0 = arith.constant 0 : i32
    %2 = arith.cmpi ne, %1, %c0_i32_0 : i32
    scf.if %2 {
      %cst_16 = arith.constant 0.000000e+00 : f32
      %23 = vector.broadcast %cst_16 : f32 to vector<16x32xf32>
      %c0_17 = arith.constant 0 : index
      %c0_18 = arith.constant 0 : index
      %24 = vector.load %arg6[%c0_17, %c0_18] : memref<16x32xf32, #tpu.memory_space<vmem>>, vector<16x32xf32>
      tpu.vector_store %arg6[%c0_17, %c0_18], %23 {strides = array<i32>} : memref<16x32xf32, #tpu.memory_space<vmem>>, vector<16x32xf32>,
    } else {
    }
    %c0 = arith.constant 0 : index
    %c0_1 = arith.constant 0 : index
    %3 = vector.load %arg2[%c0, %c0_1] : memref<16x32xf32, #tpu.memory_space<vmem>>, vector<16x32xf32>
    %c0_2 = arith.constant 0 : index
    %c0_3 = arith.constant 0 : index
    %4 = vector.load %arg3[%c0_2, %c0_3] : memref<32x512xf32, #tpu.memory_space<vmem>>, vector<32x256xf32>
    %cst = arith.constant dense<0.000000e+00> : vector<16x256xf32>
    %5 = tpu.matmul %3, %4, %cst {dimension_numbers = #tpu.dot_dimension_numbers<[1], [0], [0], [1], [0, 0, 1, 1], [], []>} : vector<16x32xf32>, vector<32x256xf32>, vector<16x256xf32> -> vector<16x256xf32>
    %c0_4 = arith.constant 0 : index
    %c256 = arith.constant 256 : index
    %6 = vector.load %arg3[%c0_4, %c256] : memref<32x512xf32, #tpu.memory_space<vmem>>, vector<32x256xf32>
    %cst_5 = arith.constant dense<0.000000e+00> : vector<16x256xf32>
    %7 = tpu.matmul %3, %6, %cst_5 {dimension_numbers = #tpu.dot_dimension_numbers<[1], [0], [0], [1], [0, 0, 1, 1], [], []>} : vector<16x32xf32>, vector<32x256xf32>, vector<16x256xf32> -> vector<16x256xf32>
    %8 = arith.negf %5 : vector<16x256xf32>
    %9 = math.exp %8 : vector<16x256xf32>
    %cst_6 = arith.constant 1.000000e+00 : f32
    %10 = vector.broadcast %cst_6 : f32 to vector<16x256xf32>
    %11 = arith.addf %10, %9 : vector<16x256xf32>
    %12 = arith.divf %10, %11 : vector<16x256xf32>
    %13 = arith.mulf %5, %12 : vector<16x256xf32>
    %14 = arith.mulf %13, %7 : vector<16x256xf32>
    %c0_7 = arith.constant 0 : index
    %c0_8 = arith.constant 0 : index
    %15 = vector.load %arg6[%c0_7, %c0_8] : memref<16x32xf32, #tpu.memory_space<vmem>>, vector<16x32xf32>
    %c0_9 = arith.constant 0 : index
    %c0_10 = arith.constant 0 : index
    %16 = vector.load %arg4[%c0_9, %c0_10] : memref<256x32xf32, #tpu.memory_space<vmem>>, vector<256x32xf32>
    %cst_11 = arith.constant dense<0.000000e+00> : vector<16x32xf32>
    %17 = tpu.matmul %14, %16, %cst_11 {dimension_numbers = #tpu.dot_dimension_numbers<[1], [0], [0], [1], [0, 0, 1, 1], [], []>} : vector<16x256xf32>, vector<256x32xf32>, vector<16x32xf32> -> vector<16x32xf32>
    %18 = arith.addf %15, %17 : vector<16x32xf32>
    %c0_12 = arith.constant 0 : index
    %c0_13 = arith.constant 0 : index
    %19 = vector.load %arg6[%c0_12, %c0_13] : memref<16x32xf32, #tpu.memory_space<vmem>>, vector<16x32xf32>
    tpu.vector_store %arg6[%c0_12, %c0_13], %18 {strides = array<i32>} : memref<16x32xf32, #tpu.memory_space<vmem>>, vector<16x32xf32>,
    %c0_i32_14 = arith.constant 0 : i32
    %20 = arith.cmpi eq, %arg1, %c0_i32_14 : i32
    %21 = arith.extui %20 : i1 to i32
    %c0_i32_15 = arith.constant 0 : i32
    %22 = arith.cmpi ne, %21, %c0_i32_15 : i32
    scf.if %22 {
      %c0_16 = arith.constant 0 : index
      %c0_17 = arith.constant 0 : index
      %23 = vector.load %arg6[%c0_16, %c0_17] : memref<16x32xf32, #tpu.memory_space<vmem>>, vector<16x32xf32>
      %c0_18 = arith.constant 0 : index
      %c0_19 = arith.constant 0 : index
      %24 = vector.load %arg5[%c0_18, %c0_19] : memref<16x32xf32, #tpu.memory_space<vmem>>, vector<16x32xf32>
      tpu.vector_store %arg5[%c0_18, %c0_19], %23 {strides = array<i32>} : memref<16x32xf32, #tpu.memory_space<vmem>>, vector<16x32xf32>,
    } else {
    }
    return
  }
  func.func @transform_0(%arg0: i32, %arg1: i32) -> (i32, i32) {
    %c0_i32 = arith.constant 0 : i32
    %c0_i32_0 = arith.constant 0 : i32
    return %arg0, %c0_i32 : i32, i32
  }
  func.func @transform_1(%arg0: i32, %arg1: i32) -> (i32, i32) {
    %c0_i32 = arith.constant 0 : i32
    %c0_i32_0 = arith.constant 0 : i32
    return %c0_i32, %arg1 : i32, i32
  }
  func.func @transform_2(%arg0: i32, %arg1: i32) -> (i32, i32) {
    %c0_i32 = arith.constant 0 : i32
    %c0_i32_0 = arith.constant 0 : i32
    return %arg1, %c0_i32 : i32, i32
  }
  func.func @transform_3(%arg0: i32, %arg1: i32) -> (i32, i32) {
    %c0_i32 = arith.constant 0 : i32
    %c0_i32_0 = arith.constant 0 : i32
    return %arg0, %c0_i32 : i32, i32
  }
}

</mosaic_0001>

<bundles_post_ra>
// kernel: tpu_custom_call.1
= control target key start
LH: loop header
LB: loop body
LE: loop exit
PB: predicated region body
PF: predicated region fallthrough
CT: control target
= control target key end

     0   :  { %vm19_vm0 = vcmask 261120   ;;  %v457_v4 = vmov 0.0   ;;  %s644_s0 = inlined_call_operand.vmem [shape: f32[16,32], index: 0, kind: input, shape index: {}]   ;;  %s645_s1 = inlined_call_operand.vmem [shape: f32[32,512], index: 1, kind: input, shape index: {}]   ;;  %s646_s2 = inlined_call_operand.vmem [shape: f32[256,32], index: 2, kind: input, shape index: {}]   ;;  %s647_s3 = inlined_call_operand.hbm [shape: f32[16,32], index: 3, kind: output, shape index: {}]  }
   0x1   :  { %v31_v0 = vld [vmem:[%s645_s1 + $0x68] sm:$0xff]  ;;  %v30_v1 = vld [vmem:[%s645_s1 + $0x60] sm:$0xff]  ;;  %103 = vmatprep.mubr.f32.mxu1 %v457_v4  ;;  %20 = vst.msk [vmem:[#allocation2] sm:$0xff] %vm19_vm0, %v457_v4  ;;  %21 = vst.msk [vmem:[#allocation2 + $0x8] sm:$0xff] %vm19_vm0, %v457_v4 }
   0x2   :  { %v29_v2 = vld [vmem:[%s645_s1 + $0x48] sm:$0xff]  ;;  %63 = vmatprep.subr.mxu1 %v31_v0  ;;  %v28_v3 = vld [vmem:[%s645_s1 + $0x40] sm:$0xff]  ;;  %v123_v10 = vld [vmem:[%s645_s1 + $0x78] sm:$0xff] }
   0x3   :  { %64 = vmatpush1.msra.mxu1 %v30_v1  ;;  %v27_v5 = vld [vmem:[%s645_s1 + $0x28] sm:$0xff]  ;;  %v26_v6 = vld [vmem:[%s645_s1 + $0x20] sm:$0xff] }
   0x4   :  { %65 = vmatprep.subr.mxu1 %v29_v2  ;;  %v25_v7 = vld [vmem:[%s645_s1 + $0x8] sm:$0xff]  ;;  %v24_v8 = vld [vmem:[%s645_s1] sm:$0xff] }
   0x5   :  { %66 = vmatpush1.msra.mxu1 %v28_v3  ;;  %v22_v9 = vld [vmem:[%s644_s0] sm:$0xff] }
   0x6   :  { %67 = vmatprep.subr.mxu1 %v27_v5 }
   0x7   :  { %68 = vmatpush1.msra.mxu1 %v26_v6 }
   0x8   :  { %8 = vsyncpa [#allocation4], 0  ;;  %69 = vmatprep.subr.mxu1 %v25_v7  ;;  %v122_v11 = vld [vmem:[%s645_s1 + $0x70] sm:$0xff]  ;;  %v121_v12 = vld [vmem:[%s645_s1 + $0x58] sm:$0xff] }
   0x9   :  { %70 = vmatpush1.msra.mxu1 %v24_v8  ;;  %v120_v13 = vld [vmem:[%s645_s1 + $0x50] sm:$0xff]  ;;  %v23_v14 = vld [vmem:[%s644_s0 + $0x8] sm:$0xff]  ;;  %v119_v15 = vld [vmem:[%s645_s1 + $0x38] sm:$0xff] }
   0xa   :  { %369 = vmatmul.mubr.msk.f32.vlgmr.msra.gmra.mxu1 %vm19_vm0, %v22_v9  ;;  %148 = vmatprep.subr.mxu1 %v123_v10  ;;  %v118_v16 = vld [vmem:[%s645_s1 + $0x30] sm:$0xff]  ;;  %v117_v17 = vld [vmem:[%s645_s1 + $0x18] sm:$0xff]  ;;  %v264_v23 = vld [vmem:[%s646_s2 + $0xe8] sm:$0xff] }
   0xb   :  { %109 = vmatprep.mubr.f32.mxu1 %v457_v4  ;;  %149 = vmatpush1.msra.mxu1 %v122_v11  ;;  %v116_v18 = vld [vmem:[%s645_s1 + $0x10] sm:$0xff]  ;;  %v266_v19 = vld [vmem:[%s646_s2 + $0xf8] sm:$0xff]  ;;  %v248_v24 = vld [vmem:[%s646_s2 + $0x68] sm:$0xff] }
   0xc   :  { %150 = vmatprep.subr.mxu1 %v121_v12  ;;  %377 = vmatprep.subr.mxu0 %v266_v19  ;;  %v250_v20 = vld [vmem:[%s646_s2 + $0x78] sm:$0xff]  ;;  %v265_v21 = vld [vmem:[%s646_s2 + $0xf0] sm:$0xff]  ;;  %v263_v25 = vld [vmem:[%s646_s2 + $0xe0] sm:$0xff] }
   0xd   :  { %151 = vmatpush1.msra.mxu1 %v120_v13  ;;  %378 = vmatpush3.msra.mxu0 %v250_v20  ;;  %v249_v22 = vld [vmem:[%s646_s2 + $0x70] sm:$0xff]  ;;  %v247_v26 = vld [vmem:[%s646_s2 + $0x60] sm:$0xff]  ;;  %v262_v27 = vld [vmem:[%s646_s2 + $0xd8] sm:$0xff] }
   0xe   :  { %370 = vmatmul.mubr.msk.f32.gmra.mxu1 %vm19_vm0, %v23_v14  ;;  %152 = vmatprep.subr.mxu1 %v119_v15  ;;  %v246_v28 = vld [vmem:[%s646_s2 + $0x58] sm:$0xff]  ;;  %v261_v29 = vld [vmem:[%s646_s2 + $0xd0] sm:$0xff]  ;;  %v260_v31 = vld [vmem:[%s646_s2 + $0xc8] sm:$0xff] }
   0xf   :  { %153 = vmatpush1.msra.mxu1 %v118_v16  ;;  %188 = vmatprep.mubr.f32.mxu1 %v457_v4  ;;  %v245_v30 = vld [vmem:[%s646_s2 + $0x50] sm:$0xff]  ;;  %v244_v32 = vld [vmem:[%s646_s2 + $0x48] sm:$0xff]  ;;  %v259_v33 = vld [vmem:[%s646_s2 + $0xc0] sm:$0xff] }
  0x10   :  { %154 = vmatprep.subr.mxu1 %v117_v17  ;;  %379 = vmatprep.subr.mxu0 %v265_v21  ;;  %v243_v34 = vld [vmem:[%s646_s2 + $0x40] sm:$0xff]  ;;  %v258_v35 = vld [vmem:[%s646_s2 + $0xb8] sm:$0xff]  ;;  %v257_v37 = vld [vmem:[%s646_s2 + $0xb0] sm:$0xff] }
  0x11   :  { %155 = vmatpush1.msra.mxu1 %v116_v18  ;;  %380 = vmatpush3.msra.mxu0 %v249_v22  ;;  %v242_v36 = vld [vmem:[%s646_s2 + $0x38] sm:$0xff]  ;;  %v241_v38 = vld [vmem:[%s646_s2 + $0x30] sm:$0xff]  ;;  %v256_v39 = vld [vmem:[%s646_s2 + $0xa8] sm:$0xff] }
  0x12   :  { %371 = vmatmul.mubr.msk.f32.vlgmr.msra.gmra.mxu1 %vm19_vm0, %v22_v9  ;;  %381 = vmatprep.subr.mxu0 %v264_v23  ;;  %v240_v40 = vld [vmem:[%s646_s2 + $0x28] sm:$0xff]  ;;  %v255_v41 = vld [vmem:[%s646_s2 + $0xa0] sm:$0xff]  ;;  %v254_v43 = vld [vmem:[%s646_s2 + $0x98] sm:$0xff] }
  0x13   :  { %194 = vmatprep.mubr.f32.mxu1 %v457_v4  ;;  %382 = vmatpush3.msra.mxu0 %v248_v24  ;;  %v239_v42 = vld [vmem:[%s646_s2 + $0x20] sm:$0xff]  ;;  %v238_v44 = vld [vmem:[%s646_s2 + $0x18] sm:$0xff]  ;;  %v253_v45 = vld [vmem:[%s646_s2 + $0x90] sm:$0xff] }
  0x14   :  { %383 = vmatprep.subr.mxu0 %v263_v25  ;;  %v237_v46 = vld [vmem:[%s646_s2 + $0x10] sm:$0xff]  ;;  %v252_v47 = vld [vmem:[%s646_s2 + $0x88] sm:$0xff]  ;;  %v251_v49 = vld [vmem:[%s646_s2 + $0x80] sm:$0xff] }
  0x15   :  { %384 = vmatpush3.msra.mxu0 %v247_v26  ;;  %v236_v48 = vld [vmem:[%s646_s2 + $0x8] sm:$0xff]  ;;  %v235_v50 = vld [vmem:[%s646_s2] sm:$0xff]  ;;  %s458_s2 = smov [#allocation3]  }
  0x16   :  { %372 = vmatmul.mubr.msk.f32.gmra.mxu1 %vm19_vm0, %v23_v14  ;;  %385 = vmatprep.subr.mxu0 %v262_v27  ;;  %v233_v20 = vld [vmem:[#allocation2] sm:$0xff]  ;;  %v234_v25 = vld [vmem:[#allocation2 + $0x8] sm:$0xff]  ;;  %s358_s25 = sshll.u32 %s458_s2, 4  ;;  %s359_s25 = int_to_ptr.vmem [resolvable:$true] %s358_s25 }
  0x17   :  { %386 = vmatpush3.msra.mxu0 %v246_v28  ;;  %s435_s26 = scalar_lea.vmem %s359_s25, 256  ;;  %p440_p1 = scmp.lt.s32.totalorder %s359_s25, %s359_s25 }
  0x18   :  { %387 = vmatprep.subr.mxu0 %v261_v29  ;;  %p436_p0 = scmp.ne.s32.totalorder %s359_s25, %s435_s26  ;;  %p441_p2 = scmp.lt.s32.totalorder %s435_s26, %s435_s26 }
  0x19   :  { %388 = vmatpush3.msra.mxu0 %v245_v30 }
  0x1a   :  { %389 = vmatprep.subr.mxu0 %v260_v31  ;;  %p442_p3 = por %p441_p2, %p440_p1 }
  0x1b   :  { %390 = vmatpush3.msra.mxu0 %v244_v32 }
  0x1c   :  { %391 = vmatprep.subr.mxu0 %v259_v33  ;;  %p443_p4 = pnand %p442_p3, %p436_p0 }
  0x1d   :  { %392 = vmatpush3.msra.mxu0 %v243_v34 }
  0x1e   :  { %393 = vmatprep.subr.mxu0 %v258_v35 }
  0x1f   :  { %394 = vmatpush3.msra.mxu0 %v242_v36 }
  0x20   :  { %395 = vmatprep.subr.mxu0 %v257_v37 }
  0x21   :  { %396 = vmatpush3.msra.mxu0 %v241_v38 }
  0x22   :  { %397 = vmatprep.subr.mxu0 %v256_v39 }
  0x23   :  { %398 = vmatpush3.msra.mxu0 %v240_v40 }
  0x24   :  { %399 = vmatprep.subr.mxu0 %v255_v41 }
  0x25   :  { %400 = vmatpush3.msra.mxu0 %v239_v42 }
  0x26   :  { %401 = vmatprep.subr.mxu0 %v254_v43 }
  0x27   :  { %402 = vmatpush3.msra.mxu0 %v238_v44 }
  0x28   :  { %403 = vmatprep.subr.mxu0 %v253_v45 }
  0x29   :  { %404 = vmatpush3.msra.mxu0 %v237_v46 }
  0x2a   :  { %405 = vmatprep.subr.mxu0 %v252_v47 }
  0x2b   :  { %406 = vmatpush3.msra.mxu0 %v236_v48 }
  0x2c   :  { %407 = vmatprep.subr.mxu0 %v251_v49 }
  0x2d   :  { %408 = vmatpush3.msra.mxu0 %v235_v50 }
  0xca   :  { %v105_v51 = vpop.f32.mrf.mxu1 }
  0xcb   :  { %v373_v52 = vmul.f32 -1.442695, %v105_v51 }
  0xcc   :  { %v107_v53 = vpop.f32.mrf.mxu1 }
  0xcd   :  { %419 = vpow2.f32 %v373_v52  ;;  %v374_v54 = vmul.f32 -1.442695, %v107_v53 }
  0xce   :  { %v111_v55 = vpop.f32.mrf.mxu1 }
  0xcf   :  { %421 = vpow2.f32 %v374_v54  ;;  %v375_v56 = vmul.f32 -1.442695, %v111_v55 }
  0xd0   :  { %v113_v57 = vpop.f32.mrf.mxu1 }
  0xd1   :  { %423 = vpow2.f32 %v375_v56  ;;  %v376_v58 = vmul.f32 -1.442695, %v113_v57 }
  0xd2   :  { %v190_v3 = vpop.f32.mrf.mxu1 }
  0xd3   :  { %425 = vpow2.f32 %v376_v58 }
  0xd4   :  { %v192_v5 = vpop.f32.mrf.mxu1 }
  0xd6   :  { %v196_v10 = vpop.f32.mrf.mxu1 }
  0xd8   :  { %v198_v16 = vpop.f32.mrf.mxu1 }
  0xda   :  { %v420_v59 = vpop.eup %419 }
  0xdb   :  { %v213_v60 = vadd.f32 1.0, %v420_v59 }
  0xdc   :  { %v422_v61 = vpop.eup %421 }
  0xdd   :  { %427 = vrcp.f32 %v213_v60  ;;  %v214_v62 = vadd.f32 1.0, %v422_v61 }
  0xde   :  { %v424_v63 = vpop.eup %423 }
  0xdf   :  { %429 = vrcp.f32 %v214_v62  ;;  %v215_v0 = vadd.f32 1.0, %v424_v63 }
  0xe0   :  { %v426_v1 = vpop.eup %425 }
  0xe1   :  { %431 = vrcp.f32 %v215_v0  ;;  %v216_v2 = vadd.f32 1.0, %v426_v1 }
  0xe3   :  { %433 = vrcp.f32 %v216_v2 }
  0xea   :  { %v428_v4 = vpop.eup %427 }
  0xeb   :  { %v225_v7 = vmul.f32 %v428_v4, %v105_v51 }
  0xec   :  { %v430_v6 = vpop.eup %429 }
  0xed   :  { %v226_v8 = vmul.f32 %v430_v6, %v107_v53  ;;  %v229_v14 = vmul.f32 %v225_v7, %v190_v3 }
  0xee   :  { %v432_v9 = vpop.eup %431 }
  0xef   :  { %v230_v11 = vmul.f32 %v226_v8, %v192_v5  ;;  %v227_v13 = vmul.f32 %v432_v9, %v111_v55 }
  0xf0   :  { %v434_v12 = vpop.eup %433 }
  0xf1   :  { %v228_v15 = vmul.f32 %v434_v12, %v113_v57  ;;  %331 = vmatprep.mubr.f32.mxu0 %v230_v11  ;;  %v231_v18 = vmul.f32 %v227_v13, %v196_v10 }
  0xf2   :  { %332 = vmatmul.mubr.f32.vlgmr.msra.gmra.mxu0 %v229_v14 }
  0xf3   :  { %v232_v17 = vmul.f32 %v228_v15, %v198_v16 }
  0xf5   :  { %336 = vmatprep.mubr.f32.mxu0 %v232_v17 }
  0xf6   :  { %337 = vmatmul.mubr.f32.gmra.mxu0 %v231_v18 }
 0x1b2   :  { %v409_v19 = vpop.f32.mrf.mxu0 }
 0x1b4   :  { %v410_v21 = vpop.f32.mrf.mxu0 }
 0x1b5   :  { %v411_v22 = vadd.f32 %v410_v21, %v409_v19 }
 0x1b6   :  { %v412_v23 = vpop.f32.mrf.mxu0 }
 0x1b7   :  { %v342_v24 = vadd.f32 %v411_v22, %v233_v20 }
 0x1b8   :  { %v413_v26 = vpop.f32.mrf.mxu0 }
 0x1b9   :  { %344 = vst.msk [vmem:[#allocation2] sm:$0xff] %vm19_vm0, %v342_v24  ;;  %v414_v27 = vadd.f32 %v413_v26, %v412_v23 }
 0x1bb   :  { %v343_v28 = vadd.f32 %v414_v27, %v234_v25 }
 0x1bd   :  { %345 = vst.msk [vmem:[#allocation2 + $0x8] sm:$0xff] %vm19_vm0, %v343_v28 }
 0x1c0   :  { %v349_v29 = vld [vmem:[#allocation2] sm:$0xff] }
 0x1c1   :  { %351 = vst.msk [vmem:[#allocation3] sm:$0xff] %vm19_vm0, %v349_v29 }
 0x1c4   :  { %v350_v30 = vld [vmem:[#allocation2 + $0x8] sm:$0xff] }
 0x1c5   :  { %352 = vst.msk [vmem:[#allocation3 + $0x8] sm:$0xff] %vm19_vm0, %v350_v30 }
 0x1c6   :  { %446 = shalt.err (!%p443_p4)
}
 0x1c7   :  { %s459_s27 = smov 128   ;;  %s460_s28 = smov 8  }
 0x1c8   :  { %364 = dma.vmem_to_hbm [thread:$0]  %s359_s25, 256, %s647_s3, [#allocation4], %s459_s27, %s459_s27, %s460_s28  }
 0x1c9   :  { %455 = dma.done.wait [#allocation4], 256  }
 0x1ca   :  { %456 = vsyncadd [#allocation4], 4294967040 }
 0x1cb   :  { %368 = vsyncpa [#allocation4], 1 }

</bundles_post_ra>
